<compile_context>
chip_gen: v5e
topology: v5e:2x2
jax: 0.10.0
libtpu: 0.0.40
codegen_flags: <defaults>
</compile_context>

<pallas_src>
import functools
import math

import jax
import jax.numpy as jnp
from jax.experimental import pallas as pl
from jax.experimental.pallas import tpu as pltpu


@functools.lru_cache(maxsize=None)
def _vmem_limit_bytes():
    """Scoped-VMEM request: 3/4 of physical, leaving headroom for compiler
    scratch / double-buffers (v7x ~48 MiB, v5e/v6e ~96 MiB)."""
    try:
        return int(pltpu.get_tpu_info().vmem_capacity_bytes * 3 // 4)
    except Exception:
        return 48 * 1024 * 1024


def _compiler_params(dim_sem):
    return pltpu.CompilerParams(dimension_semantics=dim_sem,
                                vmem_limit_bytes=_vmem_limit_bytes())


def _heads_per_block(n_head, d_k):
    """Smallest head group whose lane width is a multiple of 128 (lane-dense
    blocks/stores); falls back to all heads (block == full feature dim)."""
    for g in range(1, n_head):
        if n_head % g == 0 and (g * d_k) % 128 == 0:
            return g
    return n_head


# ---------------------------------------------------------------------------
# Kernel 1: row-tiled Linear  (q/k/v [optionally fused] and out projections)
#   x_ref: [tm, C_in],  w_ref: [C_in, C_out] (pre-transposed),  b_ref: [1, C_out]
# ---------------------------------------------------------------------------
def _linear_kernel(x_ref, w_ref, b_ref, o_ref):
    # Cast activations to the weight (MXU operand) dtype in-kernel; keeps
    # f32 accumulation via preferred_element_type, bias added in f32.
    x = x_ref[...].astype(w_ref.dtype)
    acc = jnp.dot(x, w_ref[...], preferred_element_type=jnp.float32)
    o_ref[...] = (acc + b_ref[...]).astype(o_ref.dtype)


def linear(x2, w, b, *, out_dtype=None, tm=512):
    """x2: [M, C_in] row slab; w: [C_in, C_out]; b: [C_out] (f32).

    No jnp.pad: grid uses pl.cdiv and Pallas masks the ragged final row
    block (each output row depends only on its own input row).  Weight/bias
    use a constant index_map -> DMA'd once, kept resident in VMEM.
    `tm` is sweepable (512/1024/2048) within the per-generation VMEM budget.
    """
    M, cin = x2.shape
    cout = w.shape[1]
    if out_dtype is None:
        out_dtype = x2.dtype
    tm = min(tm, M)                       # tm == M (full dim) when M is small

    return pl.pallas_call(
        _linear_kernel,
        out_shape=jax.ShapeDtypeStruct((M, cout), out_dtype),
        grid_spec=pltpu.PrefetchScalarGridSpec(
            num_scalar_prefetch=0,
            grid=(pl.cdiv(M, tm),),
            in_specs=[
                pl.BlockSpec((tm, cin), lambda i: (i, 0)),     # activation rows
                pl.BlockSpec((cin, cout), lambda i: (0, 0)),   # resident weight
                pl.BlockSpec((1, cout), lambda i: (0, 0)),     # resident bias
            ],
            out_specs=pl.BlockSpec((tm, cout), lambda i: (i, 0)),
        ),
        compiler_params=_compiler_params(("parallel",)),
    )(x2, w, b.reshape(1, cout))


# ---------------------------------------------------------------------------
# Kernel 2: per-(batch, head-group) scaled-dot-product attention.
#   Blocks are (1, T, G*d_k) column slices of the [B, T, C]-layout slabs, so
#   no head split/merge transposes ever materialize and the output store is
#   lane-dense (width = G*d_k, a 128-multiple at real BERT sizes).
# ---------------------------------------------------------------------------
def _attn_kernel(q_ref, k_ref, v_ref, o_ref, *, heads_per_blk, d_k, scale):
    ctx_parts = []
    for g in range(heads_per_blk):                      # tiny, fully unrolled
        lo = g * d_k
        # scale folded into q: T1*d_k muls instead of T1*T2
        q = q_ref[0, :, lo:lo + d_k] * scale            # (T1, d_k)
        k = k_ref[0, :, lo:lo + d_k]                    # (T2, d_k)
        v = v_ref[0, :, lo:lo + d_k]                    # (T2, d_k)

        s = jax.lax.dot_general(                        # (T1, T2), f32 acc
            q, k, dimension_numbers=(((1,), (1,)), ((), ())),
            preferred_element_type=jnp.float32)

        # numerically-stable softmax; normalization deferred until after the
        # PV matmul (T1*d_k muls + EUP reciprocal instead of T1*T2 divides)
        m = jnp.max(s, axis=-1, keepdims=True)
        p = jnp.exp(s - m)
        l = jnp.sum(p, axis=-1, keepdims=True)

        # (attention dropout = identity in eval mode)
        ctx = jnp.dot(p.astype(v.dtype), v,
                      preferred_element_type=jnp.float32)   # (T1, d_k)
        ctx_parts.append(ctx * pl.reciprocal(l, approx=True))

    # single lane-dense store of the whole head group
    o_ref[0, :, :] = jnp.concatenate(ctx_parts, axis=-1).astype(o_ref.dtype)


def _attention_core(q3, k3, v3, *, n_head, d_k, heads_per_blk, scale,
                    out_dtype, q_blk_off=0, k_blk_off=0, v_blk_off=0):
    """q3/k3/v3: [B, T, *]-layout slabs (may all alias the fused QKV slab;
    *_blk_off are block offsets along the feature axis).  Returns the merged
    context directly in [B, T1, C] layout."""
    B, T1 = q3.shape[0], q3.shape[1]
    T2 = k3.shape[1]
    C = n_head * d_k
    w_blk = heads_per_blk * d_k
    n_grp = n_head // heads_per_blk

    kern = functools.partial(_attn_kernel, heads_per_blk=heads_per_blk,
                             d_k=d_k, scale=scale)
    return pl.pallas_call(
        kern,
        out_shape=jax.ShapeDtypeStruct((B, T1, C), out_dtype),
        grid_spec=pltpu.PrefetchScalarGridSpec(
            num_scalar_prefetch=0,
            grid=(B, n_grp),
            in_specs=[
                pl.BlockSpec((1, T1, w_blk),
                             lambda b, g, o=q_blk_off: (b, 0, o + g)),
                pl.BlockSpec((1, T2, w_blk),
                             lambda b, g, o=k_blk_off: (b, 0, o + g)),
                pl.BlockSpec((1, T2, w_blk),
                             lambda b, g, o=v_blk_off: (b, 0, o + g)),
            ],
            out_specs=pl.BlockSpec((1, T1, w_blk), lambda b, g: (b, 0, g)),
        ),
        compiler_params=_compiler_params(("parallel", "parallel")),
    )(q3, k3, v3)


# ---------------------------------------------------------------------------
# Full MultiHeadedAttention forward (eval mode, key_padding_mask=None).
# Weights are stored pre-transposed as [in, out] (torch nn.Linear keeps
# [out, in] and applies x @ W^T).
# ---------------------------------------------------------------------------
def multi_headed_attention(query, key, value,
                           w_q, b_q, w_k, b_k, w_v, b_v, w_out, b_out,
                           n_head, *, compute_dtype=None, tm=512):
    B, T1, C = query.shape
    T2 = key.shape[1]
    assert C % n_head == 0
    d_k = C // n_head
    scale = 1.0 / math.sqrt(d_k)
    out_dtype = query.dtype
    cdt = out_dtype if compute_dtype is None else compute_dtype

    # MXU operands in compute dtype (weights are small; biases stay f32 and
    # are added to the f32 accumulator inside the kernel).
    w_q, w_k, w_v, w_out = (w.astype(cdt) for w in (w_q, w_k, w_v, w_out))

    heads_per_blk = _heads_per_block(n_head, d_k)
    w_blk = heads_per_blk * d_k
    n_grp = n_head // heads_per_blk

    # Fused QKV projection for self-attention; only when the attention kernel
    # can read head groups directly out of the [B, T, 3C] slab (lane-aligned).
    fuse_qkv = (query is key) and (key is value) and (w_blk % 128 == 0)

    if fuse_qkv:
        w_qkv = jnp.concatenate([w_q, w_k, w_v], axis=1)          # [C, 3C]
        b_qkv = jnp.concatenate([b_q, b_k, b_v], axis=0)          # [3C]
        qkv = linear(query.reshape(B * T1, C), w_qkv, b_qkv,
                     out_dtype=cdt, tm=tm).reshape(B, T1, 3 * C)
        ctx = _attention_core(qkv, qkv, qkv,
                              n_head=n_head, d_k=d_k,
                              heads_per_blk=heads_per_blk, scale=scale,
                              out_dtype=cdt,
                              q_blk_off=0, k_blk_off=n_grp,
                              v_blk_off=2 * n_grp)
    else:
        q = linear(query.reshape(B * T1, C), w_q, b_q, out_dtype=cdt, tm=tm)
        k = linear(key.reshape(B * T2, C), w_k, b_k, out_dtype=cdt, tm=tm)
        v = linear(value.reshape(B * T2, C), w_v, b_v, out_dtype=cdt, tm=tm)
        ctx = _attention_core(q.reshape(B, T1, C),
                              k.reshape(B, T2, C),
                              v.reshape(B, T2, C),
                              n_head=n_head, d_k=d_k,
                              heads_per_blk=heads_per_blk, scale=scale,
                              out_dtype=cdt)

    out = linear(ctx.reshape(B * T1, C), w_out, b_out,
                 out_dtype=out_dtype, tm=tm)
    return out.reshape(B, T1, C)


# ---------------------------------------------------------------------------
# Pure-JAX reference
# ---------------------------------------------------------------------------
def reference_mha(query, key, value,
                  w_q, b_q, w_k, b_k, w_v, b_v, w_o, b_o, n_head):
    B, T1, C = query.shape
    T2 = key.shape[1]
    d_k = C // n_head
    q = (query @ w_q + b_q).reshape(B, T1, n_head, d_k).transpose(0, 2, 1, 3)
    k = (key @ w_k + b_k).reshape(B, T2, n_head, d_k).transpose(0, 2, 1, 3)
    v = (value @ w_v + b_v).reshape(B, T2, n_head, d_k).transpose(0, 2, 1, 3)
    scores = jnp.einsum("bhqd,bhkd->bhqk", q, k) / math.sqrt(d_k)
    attn = jax.nn.softmax(scores, axis=-1)
    ctx = jnp.einsum("bhqk,bhkd->bhqd", attn, v)
    ctx = ctx.transpose(0, 2, 1, 3).reshape(B, T1, C)
    return ctx @ w_o + b_o


if __name__ == "__main__":
    def make_params(key, C):
        ks = jax.random.split(key, 8)
        bound = 1.0 / math.sqrt(C)          # nn.Linear-like init, stored [in,out]
        u = lambda k, s: jax.random.uniform(k, s, jnp.float32, -bound, bound)
        return (u(ks[0], (C, C)), u(ks[1], (C,)),
                u(ks[2], (C, C)), u(ks[3], (C,)),
                u(ks[4], (C, C)), u(ks[5], (C,)),
                u(ks[6], (C, C)), u(ks[7], (C,)))

    root = jax.random.PRNGKey(0)

    # --- case 1: cross-attention, tiny C (fallback head grouping), f32 ------
    B, T1, T2, C, H = 2, 8, 16, 32, 4                    # d_k = 8
    k0, k1, k2, k3 = jax.random.split(root, 4)
    q_in = jax.random.normal(k0, (B, T1, C), jnp.float32)
    k_in = jax.random.normal(k1, (B, T2, C), jnp.float32)
    v_in = jax.random.normal(k2, (B, T2, C), jnp.float32)
    params = make_params(k3, C)
    out = jax.block_until_ready(
        multi_headed_attention(q_in, k_in, v_in, *params, H))
    ref = reference_mha(q_in, k_in, v_in, *params, H)
    assert out.shape == (B, T1, C)
    assert jnp.allclose(out, ref, atol=2e-3, rtol=2e-3), \
        float(jnp.max(jnp.abs(out - ref)))

    # --- case 2: self-attention (fused QKV, lane-dense head groups), f32 ----
    B, T, C, H = 2, 16, 256, 4                           # d_k = 64 -> G = 2
    k0, k1 = jax.random.split(jax.random.fold_in(root, 1), 2)
    x_in = jax.random.normal(k0, (B, T, C), jnp.float32)
    params = make_params(k1, C)
    out = jax.block_until_ready(
        multi_headed_attention(x_in, x_in, x_in, *params, H))
    ref = reference_mha(x_in, x_in, x_in, *params, H)
    assert out.shape == (B, T, C)
    assert jnp.allclose(out, ref, atol=2e-3, rtol=2e-3), \
        float(jnp.max(jnp.abs(out - ref)))

    # --- case 3: same self-attention, bf16 MXU operands (f32 accumulation) --
    out_bf16 = jax.block_until_ready(
        multi_headed_attention(x_in, x_in, x_in, *params, H,
                               compute_dtype=jnp.bfloat16))
    assert out_bf16.dtype == jnp.float32
    assert jnp.allclose(out_bf16, ref, atol=1e-1, rtol=1e-1), \
        float(jnp.max(jnp.abs(out_bf16 - ref)))

    print("KERNEL_OK")
</pallas_src>

<mosaic_0001>
module attributes {stable_mosaic.version = 11 : i64} {
  func.func @_linear_kernel(%arg0: i32, %arg1: memref<16x32xf32, #tpu.memory_space<vmem>>, %arg2: memref<32x32xf32, #tpu.memory_space<vmem>>, %arg3: memref<1x32xf32, #tpu.memory_space<vmem>>, %arg4: memref<16x32xf32, #tpu.memory_space<vmem>>) attributes {dimension_semantics = [#tpu.dimension_semantics<parallel>], iteration_bounds = array<i64: 1>, scalar_prefetch = 0 : i64, scratch_operands = 0 : i64, tpu.core_type = #tpu.core_type<tc>, window_params = [{transform_indices = @transform_0, window_bounds = array<i64: 16, 32>}, {pipeline_mode = #tpu.pipeline_mode<synchronous>, transform_indices = @transform_1, window_bounds = array<i64: 32, 32>}, {pipeline_mode = #tpu.pipeline_mode<synchronous>, transform_indices = @transform_2, window_bounds = array<i64: 1, 32>}, {transform_indices = @transform_3, window_bounds = array<i64: 16, 32>}]} {
    %c0 = arith.constant 0 : index
    %c0_0 = arith.constant 0 : index
    %0 = vector.load %arg1[%c0, %c0_0] : memref<16x32xf32, #tpu.memory_space<vmem>>, vector<16x32xf32>
    %c0_1 = arith.constant 0 : index
    %c0_2 = arith.constant 0 : index
    %1 = vector.load %arg2[%c0_1, %c0_2] : memref<32x32xf32, #tpu.memory_space<vmem>>, vector<32x32xf32>
    %cst = arith.constant dense<0.000000e+00> : vector<16x32xf32>
    %2 = tpu.matmul %0, %1, %cst {dimension_numbers = #tpu.dot_dimension_numbers<[1], [0], [0], [1], [0, 0, 1, 1], [], []>} : vector<16x32xf32>, vector<32x32xf32>, vector<16x32xf32> -> vector<16x32xf32>
    %c0_3 = arith.constant 0 : index
    %c0_4 = arith.constant 0 : index
    %3 = vector.load %arg3[%c0_3, %c0_4] : memref<1x32xf32, #tpu.memory_space<vmem>>, vector<1x32xf32>
    %4 = vector.broadcast %3 : vector<1x32xf32> to vector<16x32xf32>
    %5 = arith.addf %2, %4 : vector<16x32xf32>
    %c0_5 = arith.constant 0 : index
    %c0_6 = arith.constant 0 : index
    %6 = vector.load %arg4[%c0_5, %c0_6] : memref<16x32xf32, #tpu.memory_space<vmem>>, vector<16x32xf32>
    tpu.vector_store %arg4[%c0_5, %c0_6], %5 {strides = array<i32>} : memref<16x32xf32, #tpu.memory_space<vmem>>, vector<16x32xf32>,
    return
  }
  func.func @transform_0(%arg0: i32) -> (i32, i32) {
    %c0_i32 = arith.constant 0 : i32
    %c0_i32_0 = arith.constant 0 : i32
    return %arg0, %c0_i32 : i32, i32
  }
  func.func @transform_1(%arg0: i32) -> (i32, i32) {
    %c0_i32 = arith.constant 0 : i32
    %c0_i32_0 = arith.constant 0 : i32
    %c0_i32_1 = arith.constant 0 : i32
    return %c0_i32, %c0_i32_0 : i32, i32
  }
  func.func @transform_2(%arg0: i32) -> (i32, i32) {
    %c0_i32 = arith.constant 0 : i32
    %c0_i32_0 = arith.constant 0 : i32
    %c0_i32_1 = arith.constant 0 : i32
    return %c0_i32, %c0_i32_0 : i32, i32
  }
  func.func @transform_3(%arg0: i32) -> (i32, i32) {
    %c0_i32 = arith.constant 0 : i32
    %c0_i32_0 = arith.constant 0 : i32
    return %arg0, %c0_i32 : i32, i32
  }
}

</mosaic_0001>

<bundles_post_ra>
// kernel: tpu_custom_call.1
= control target key start
LH: loop header
LB: loop body
LE: loop exit
PB: predicated region body
PF: predicated region fallthrough
CT: control target
= control target key end

     0   :  { %8 = vsyncpa [#allocation3], 0  ;;  %s249_s0 = inlined_call_operand.hbm [shape: f32[16,32], index: 0, kind: input, shape index: {}]   ;;  %s250_s1 = inlined_call_operand.hbm [shape: f32[32,32], index: 1, kind: input, shape index: {}]   ;;  %s251_s2 = inlined_call_operand.vmem [shape: f32[1,32], index: 2, kind: input, shape index: {}]   ;;  %s252_s3 = inlined_call_operand.hbm [shape: f32[16,32], index: 3, kind: output, shape index: {}]  }
   0x1   :  { %9 = vsyncpa [#allocation6], 0 }
   0x2   :  { %10 = vsyncpa [#allocation4], 0  ;;  %s15_s14 = sshll.u32 %s249_s0, 4  ;;  %s199_s15 = smov [#allocation2]   ;;  %s16_s14 = int_to_ptr.hbm [resolvable:$true] %s15_s14 }
   0x3   :  { %s17_s16 = sshll.u32 %s199_s15, 4  ;;  %s28_s19 = sshll.u32 %s250_s1, 4  ;;  %s18_s16 = int_to_ptr.vmem [resolvable:$true] %s17_s16  ;;  %s29_s19 = int_to_ptr.hbm [resolvable:$true] %s28_s19 }
   0x4   :  { %s200_s20 = smov 128   ;;  %s201_s21 = smov 8  }
   0x5   :  { %23 = dma.hbm_to_vmem [thread:$0]  %s16_s14, 256, %s18_s16, [#allocation3], %s200_s20, %s200_s20, %s201_s21  }
   0x6   :  { %s202_s22 = smov [#allocation5]  }
   0x7   :  { %s30_s23 = sshll.u32 %s202_s22, 4  ;;  %s31_s23 = int_to_ptr.vmem [resolvable:$true] %s30_s23 }
   0x8   :  { %36 = dma.hbm_to_vmem [thread:$0]  %s29_s19, 512, %s31_s23, [#allocation6], %s200_s20, %s200_s20, %s201_s21  }
   0x9   :  { %193 = dma.done.wait [#allocation3], 256  }
   0xa   :  { %194 = vsyncadd [#allocation3], 4294967040 }
   0xb   :  { %195 = dma.done.wait [#allocation6], 512  }
   0xc   :  { %196 = vsyncadd [#allocation6], 4294966784  ;;  %v52_v0 = vld [vmem:[#allocation5 + $0x18] sm:$0xff]  ;;  %v51_v1 = vld [vmem:[#allocation5 + $0x10] sm:$0xff]  ;;  %vm57_vm0 = vcmask 261120   ;;  %s203_s24 = smov [#allocation7]  }
   0xd   :  { %76 = vmatpush.msra.mxu0 %v52_v0  ;;  %111 = vmatpush.msra.mxu1 %v52_v0  ;;  %v50_v2 = vld [vmem:[#allocation5 + $0x8] sm:$0xff]  ;;  %v49_v3 = vld [vmem:[#allocation5] sm:$0xff]  ;;  %v47_v4 = vld [vmem:[#allocation2] sm:$0xff]  ;;  %s93_s25 = sshll.u32 %s203_s24, 4  ;;  %s95_s28 = sshll.u32 %s252_s3, 4  ;;  %s94_s25 = int_to_ptr.vmem [resolvable:$true] %s93_s25  ;;  %s96_s28 = int_to_ptr.hbm [resolvable:$true] %s95_s28 }
   0xe   :  { %v48_v5 = vld [vmem:[#allocation2 + $0x8] sm:$0xff]  ;;  %v120_v6 = vld [vmem:[%s251_s2] ss:$0 sm:$0xff] }
   0xf   :  { %77 = vmatpush.msra.mxu0 %v51_v1  ;;  %112 = vmatpush.msra.mxu1 %v51_v1 }
  0x11   :  { %78 = vmatpush.msra.mxu0 %v50_v2  ;;  %113 = vmatpush.msra.mxu1 %v50_v2 }
  0x13   :  { %79 = vmatpush.msra.mxu0 %v49_v3  ;;  %114 = vmatpush.msra.mxu1 %v49_v3 }
  0x14   :  { %109 = vmatmul.msk.f32.vlgmr.msra.gmra.mxu0 %vm57_vm0, %v47_v4  ;;  %110 = vmatmul.msk.f32.vlgmr.msra.gmra.mxu1 %vm57_vm0, %v48_v5 }
  0x91   :  { %v81_v7 = vpop.f32.mrf.mxu0  ;;  %v84_v8 = vpop.f32.mrf.mxu1 }
  0x92   :  { %v82_v9 = vadd.f32 %v120_v6, %v81_v7  ;;  %v85_v10 = vadd.f32 %v120_v6, %v84_v8 }
  0x94   :  { %87 = vst.msk [vmem:[#allocation7] sm:$0xff] %vm57_vm0, %v82_v9 }
  0x95   :  { %88 = vst.msk [vmem:[#allocation7 + $0x8] sm:$0xff] %vm57_vm0, %v85_v10 }
  0x96   :  { %101 = dma.vmem_to_hbm [thread:$0]  %s94_s25, 256, %s96_s28, [#allocation4], %s200_s20, %s200_s20, %s201_s21  }
  0x97   :  { %197 = dma.done.wait [#allocation4], 256  }
  0x98   :  { %198 = vsyncadd [#allocation4], 4294967040 }
  0x99   :  { %106 = vsyncpa [#allocation3], 1 }
  0x9a   :  { %107 = vsyncpa [#allocation6], 1 }
  0x9b   :  { %108 = vsyncpa [#allocation4], 1 }

</bundles_post_ra>
